<compile_context>
chip_gen: v5e
topology: v5e:2x2
jax: 0.10.0
libtpu: 0.0.40
codegen_flags: <defaults>
</compile_context>

<pallas_src>
import math
import functools

import jax
import jax.numpy as jnp
from jax.experimental import pallas as pl
from jax.experimental.pallas import tpu as pltpu

NEG_MASK = -1000000000000000.0  # exact constant used by the PyTorch module


def _round_up(x, m):
    return ((x + m - 1) // m) * m


def _pick_tile(dim, cap, align):
    """Tile = full dim when small (block equal to full dim is always legal),
    otherwise `cap` (a multiple of `align`) with the dim padded to a tile multiple."""
    if dim <= cap:
        return dim, dim
    assert cap % align == 0
    return cap, _round_up(dim, cap)


# ----------------------------------------------------------------------------- #
# Tiled linear: y = x @ W + b                                                    #
# ----------------------------------------------------------------------------- #
def _linear_kernel(x_ref, w_ref, b_ref, o_ref):
    # x: (tm, K), w: (K, tn), b: (1, tn) -- all f32; bias folded into epilogue.
    acc = jnp.dot(x_ref[...], w_ref[...], preferred_element_type=jnp.float32)
    o_ref[...] = (acc + b_ref[...]).astype(o_ref.dtype)


def linear_pallas(x2d, w, b, *, tm_cap=256, tn_cap=512):
    """Tiled over (M, N); the contraction dim K stays whole per tile (small here).
    For very large K, add a third grid axis + f32 VMEM accumulator (pl.when init/final)."""
    M, K = x2d.shape
    N = w.shape[1]
    tm, Mp = _pick_tile(M, tm_cap, 8)
    tn, Np = _pick_tile(N, tn_cap, 128)
    if Mp != M:
        x2d = jnp.pad(x2d, ((0, Mp - M), (0, 0)))
    if Np != N:
        w = jnp.pad(w, ((0, 0), (0, Np - N)))
        b = jnp.pad(b, (0, Np - N))
    b2d = b.reshape(1, Np)

    out = pl.pallas_call(
        _linear_kernel,
        out_shape=jax.ShapeDtypeStruct((Mp, Np), x2d.dtype),
        grid_spec=pltpu.PrefetchScalarGridSpec(
            num_scalar_prefetch=0,
            grid=(Mp // tm, Np // tn),
            in_specs=[
                pl.BlockSpec((tm, K), lambda i, j: (i, 0)),
                pl.BlockSpec((K, tn), lambda i, j: (0, j)),
                pl.BlockSpec((1, tn), lambda i, j: (0, j)),
            ],
            out_specs=pl.BlockSpec((tm, tn), lambda i, j: (i, j)),
        ),
        compiler_params=pltpu.CompilerParams(
            dimension_semantics=("parallel", "parallel")),
        cost_estimate=pl.CostEstimate(
            flops=2 * Mp * K * Np,
            transcendentals=0,
            bytes_accessed=4 * (Mp * K + K * Np + Np + Mp * Np)),
    )(x2d, w, b2d)
    if Mp != M or Np != N:
        out = out[:M, :N]
    return out


# ----------------------------------------------------------------------------- #
# Flash-style cross attention with additive mask (online softmax over kv tiles)  #
# ----------------------------------------------------------------------------- #
def _cross_attn_kernel(q_ref, k_ref, v_ref, mask_ref, o_ref,
                       m_sc, l_sc, acc_sc, *, scale):
    ki = pl.program_id(2)

    @pl.when(ki == 0)
    def _():
        m_sc[...] = jnp.full_like(m_sc, -jnp.inf)
        l_sc[...] = jnp.zeros_like(l_sc)
        acc_sc[...] = jnp.zeros_like(acc_sc)

    q = q_ref[...]                         # (1, tq, d) f32
    k = k_ref[...]                         # (1, tk, d) f32
    s = jnp.einsum('bqd,bkd->bqk', q, k,
                   preferred_element_type=jnp.float32) * scale
    s = s + mask_ref[...][:, None, :]      # additive mask, broadcast over queries

    m_new = jnp.maximum(m_sc[...], s.max(-1, keepdims=True))
    alpha = jnp.exp(m_sc[...] - m_new)
    p = jnp.exp(s - m_new)
    l_sc[...] = alpha * l_sc[...] + p.sum(-1, keepdims=True)
    acc_sc[...] = alpha * acc_sc[...] + jnp.einsum(
        'bqk,bkd->bqd', p, v_ref[...], preferred_element_type=jnp.float32)
    m_sc[...] = m_new

    @pl.when(ki == pl.num_programs(2) - 1)
    def _():
        o_ref[...] = (acc_sc[...] / l_sc[...]).astype(o_ref.dtype)


def flash_cross_attention(q, k, v, add_mask, *, scale, tq_cap=128, tk_cap=128):
    """q: (BH, Lq, d), k/v: (BH, Lk, d), add_mask: (BH, Lk) additive (already * -1e15)."""
    BH, Lq, Dh = q.shape
    Lk = k.shape[1]
    tq, Lqp = _pick_tile(Lq, tq_cap, 8)
    tk, Lkp = _pick_tile(Lk, tk_cap, 8)
    if Lqp != Lq:
        q = jnp.pad(q, ((0, 0), (0, Lqp - Lq), (0, 0)))
    if Lkp != Lk:
        k = jnp.pad(k, ((0, 0), (0, Lkp - Lk), (0, 0)))
        v = jnp.pad(v, ((0, 0), (0, Lkp - Lk), (0, 0)))
        add_mask = jnp.pad(add_mask, ((0, 0), (0, Lkp - Lk)),
                           constant_values=NEG_MASK)

    out = pl.pallas_call(
        functools.partial(_cross_attn_kernel, scale=scale),
        out_shape=jax.ShapeDtypeStruct((BH, Lqp, Dh), q.dtype),
        grid_spec=pltpu.PrefetchScalarGridSpec(
            num_scalar_prefetch=0,
            grid=(BH, Lqp // tq, Lkp // tk),          # reduction (kv) axis last
            in_specs=[
                pl.BlockSpec((1, tq, Dh), lambda b, qi, ki: (b, qi, 0)),
                pl.BlockSpec((1, tk, Dh), lambda b, qi, ki: (b, ki, 0)),
                pl.BlockSpec((1, tk, Dh), lambda b, qi, ki: (b, ki, 0)),
                pl.BlockSpec((1, tk), lambda b, qi, ki: (b, ki)),
            ],
            out_specs=pl.BlockSpec((1, tq, Dh), lambda b, qi, ki: (b, qi, 0)),
            scratch_shapes=[
                pltpu.VMEM((1, tq, 1), jnp.float32),   # running max
                pltpu.VMEM((1, tq, 1), jnp.float32),   # running denom
                pltpu.VMEM((1, tq, Dh), jnp.float32),  # output accumulator
            ],
        ),
        compiler_params=pltpu.CompilerParams(
            dimension_semantics=("parallel", "parallel", "arbitrary")),
        cost_estimate=pl.CostEstimate(
            flops=4 * BH * Lqp * Lkp * Dh,
            transcendentals=BH * Lqp * Lkp,
            bytes_accessed=4 * BH * (2 * Lqp * Dh + 2 * Lkp * Dh + Lkp)),
    )(q, k, v, add_mask)
    if Lqp != Lq:
        out = out[:, :Lq, :]
    return out


# ----------------------------------------------------------------------------- #
# Attention_output: Linear + residual + LayerNorm fused (dropout = identity)     #
# ----------------------------------------------------------------------------- #
def _attn_output_kernel(h_ref, w_ref, b_ref, res_ref, g_ref, beta_ref, o_ref):
    acc = jnp.dot(h_ref[...], w_ref[...], preferred_element_type=jnp.float32)
    y = acc + b_ref[...] + res_ref[...]
    mean = jnp.mean(y, axis=-1, keepdims=True)
    c = y - mean
    var = jnp.mean(c * c, axis=-1, keepdims=True)
    inv = jax.lax.rsqrt(var + 1e-5)
    o_ref[...] = (c * inv * g_ref[...] + beta_ref[...]).astype(o_ref.dtype)


def attention_output_pallas(h2d, w, b, res2d, gamma, beta, *, tm_cap=256):
    M, K = h2d.shape
    N = w.shape[1]            # LayerNorm reduces over N -> keep feature dim whole
    tm, Mp = _pick_tile(M, tm_cap, 8)
    if Mp != M:
        h2d = jnp.pad(h2d, ((0, Mp - M), (0, 0)))
        res2d = jnp.pad(res2d, ((0, Mp - M), (0, 0)))

    out = pl.pallas_call(
        _attn_output_kernel,
        out_shape=jax.ShapeDtypeStruct((Mp, N), h2d.dtype),
        grid_spec=pltpu.PrefetchScalarGridSpec(
            num_scalar_prefetch=0,
            grid=(Mp // tm,),
            in_specs=[
                pl.BlockSpec((tm, K), lambda i: (i, 0)),
                pl.BlockSpec((K, N), lambda i: (0, 0)),
                pl.BlockSpec((1, N), lambda i: (0, 0)),
                pl.BlockSpec((tm, N), lambda i: (i, 0)),
                pl.BlockSpec((1, N), lambda i: (0, 0)),
                pl.BlockSpec((1, N), lambda i: (0, 0)),
            ],
            out_specs=pl.BlockSpec((tm, N), lambda i: (i, 0)),
        ),
        compiler_params=pltpu.CompilerParams(
            dimension_semantics=("parallel",)),
        cost_estimate=pl.CostEstimate(
            flops=2 * Mp * K * N + 8 * Mp * N,
            transcendentals=Mp,
            bytes_accessed=4 * (Mp * K + K * N + 3 * N + 2 * Mp * N)),
    )(h2d, w, b.reshape(1, N), res2d, gamma.reshape(1, N), beta.reshape(1, N))
    if Mp != M:
        out = out[:M]
    return out


# ----------------------------------------------------------------------------- #
# Full Cross_attention_layer forward                                             #
# ----------------------------------------------------------------------------- #
def cross_attention_layer(params, query_input, value_input, v_mask, *, head_num):
    B, Lq, Din = query_input.shape
    _, Lv, _ = value_input.shape
    out_dim = params['wq'].shape[1]
    H = head_num
    Dh = out_dim // H

    q2d = query_input.reshape(B * Lq, Din)
    x_v2d = value_input.reshape(B * Lv, Din)

    # Q projection; K and V fused into a single matmul (same input, one MXU pass).
    Q = linear_pallas(q2d, params['wq'], params['bq'])
    wkv = jnp.concatenate([params['wk'], params['wv']], axis=1)
    bkv = jnp.concatenate([params['bk'], params['bv']], axis=0)
    KV = linear_pallas(x_v2d, wkv, bkv)
    K = KV[:, :out_dim]
    V = KV[:, out_dim:]

    def to_heads(x2d, L):
        return (x2d.reshape(B, L, H, Dh)
                   .transpose(0, 2, 1, 3)
                   .reshape(B * H, L, Dh))

    Qh = to_heads(Q, Lq)
    Kh = to_heads(K, Lv)
    Vh = to_heads(V, Lv)

    # Additive mask, replicated per head (rows ordered to match bh = b*H + h).
    add_mask = jnp.repeat(v_mask.astype(jnp.float32) * NEG_MASK, H, axis=0)

    ctx = flash_cross_attention(Qh, Kh, Vh, add_mask, scale=1.0 / math.sqrt(Dh))
    ctx2d = (ctx.reshape(B, H, Lq, Dh)
                .transpose(0, 2, 1, 3)
                .reshape(B * Lq, out_dim))

    # Attention_output: Linear(out_dim -> in_dim) + dropout + LayerNorm(residual).
    # TODO(synk): training-mode dropout (p=0.2) is omitted; eval-mode (identity) semantics.
    out2d = attention_output_pallas(ctx2d, params['wo'], params['bo'],
                                    q2d, params['ln_gamma'], params['ln_beta'])
    return out2d.reshape(B, Lq, Din)


# ----------------------------------------------------------------------------- #
# Self-check                                                                      #
# ----------------------------------------------------------------------------- #
def _reference(params, query_input, value_input, v_mask, *, head_num):
    hi = jax.lax.Precision.HIGHEST
    B, Lq, Din = query_input.shape
    _, Lv, _ = value_input.shape
    out_dim = params['wq'].shape[1]
    H = head_num
    Dh = out_dim // H

    Q = jnp.matmul(query_input, params['wq'], precision=hi) + params['bq']
    K = jnp.matmul(value_input, params['wk'], precision=hi) + params['bk']
    V = jnp.matmul(value_input, params['wv'], precision=hi) + params['bv']

    def split(x, L):
        return x.reshape(B, L, H, Dh).transpose(0, 2, 1, 3)

    Qh, Kh, Vh = split(Q, Lq), split(K, Lv), split(V, Lv)
    score = jnp.einsum('bhqd,bhkd->bhqk', Qh, Kh, precision=hi) / math.sqrt(Dh)
    score = score + v_mask[:, None, None, :] * NEG_MASK
    att = jax.nn.softmax(score, axis=-1)
    ctx = jnp.einsum('bhqk,bhkd->bhqd', att, Vh, precision=hi)
    ctx = ctx.transpose(0, 2, 1, 3).reshape(B, Lq, out_dim)

    h = jnp.matmul(ctx, params['wo'], precision=hi) + params['bo']
    y = h + query_input
    mean = y.mean(-1, keepdims=True)
    var = ((y - mean) ** 2).mean(-1, keepdims=True)
    return (y - mean) / jnp.sqrt(var + 1e-5) * params['ln_gamma'] + params['ln_beta']


if __name__ == "__main__":
    bs, q_len, v_len = 2, 8, 16
    in_dim, out_dim, head_num = 32, 32, 2

    key = jax.random.PRNGKey(0)
    ks = jax.random.split(key, 13)

    def uni(k, shape, bnd):
        return jax.random.uniform(k, shape, jnp.float32, -bnd, bnd)

    bnd_i = 1.0 / math.sqrt(in_dim)
    bnd_o = 1.0 / math.sqrt(out_dim)
    params = dict(
        wq=uni(ks[0], (in_dim, out_dim), bnd_i), bq=uni(ks[1], (out_dim,), bnd_i),
        wk=uni(ks[2], (in_dim, out_dim), bnd_i), bk=uni(ks[3], (out_dim,), bnd_i),
        wv=uni(ks[4], (in_dim, out_dim), bnd_i), bv=uni(ks[5], (out_dim,), bnd_i),
        wo=uni(ks[6], (out_dim, in_dim), bnd_o), bo=uni(ks[7], (in_dim,), bnd_o),
        ln_gamma=1.0 + 0.1 * jax.random.normal(ks[8], (in_dim,), jnp.float32),
        ln_beta=0.1 * jax.random.normal(ks[9], (in_dim,), jnp.float32),
    )

    query_input = jax.random.normal(ks[10], (bs, q_len, in_dim), jnp.float32)
    value_input = jax.random.normal(ks[11], (bs, v_len, in_dim), jnp.float32)
    v_mask = (jax.random.uniform(ks[12], (bs, v_len)) < 0.3).astype(jnp.float32)
    v_mask = v_mask.at[:, 0].set(0.0)   # guarantee at least one unmasked key per row

    y = cross_attention_layer(params, query_input, value_input, v_mask,
                              head_num=head_num)
    jax.block_until_ready(y)

    y_ref = _reference(params, query_input, value_input, v_mask, head_num=head_num)
    assert y.shape == (bs, q_len, in_dim)
    max_diff = float(jnp.max(jnp.abs(y - y_ref)))
    assert jnp.allclose(y, y_ref, atol=2e-3, rtol=2e-3), f"max diff {max_diff}"

    print("KERNEL_OK")
</pallas_src>

<mosaic_0001>
module attributes {stable_mosaic.version = 11 : i64} {
  func.func @_linear_kernel(%arg0: i32, %arg1: i32, %arg2: memref<16x32xf32, #tpu.memory_space<vmem>>, %arg3: memref<32x32xf32, #tpu.memory_space<vmem>>, %arg4: memref<1x32xf32, #tpu.memory_space<vmem>>, %arg5: memref<16x32xf32, #tpu.memory_space<vmem>>) attributes {dimension_semantics = [#tpu.dimension_semantics<parallel>, #tpu.dimension_semantics<parallel>], iteration_bounds = array<i64: 1, 1>, scalar_prefetch = 0 : i64, scratch_operands = 0 : i64, tpu.core_type = #tpu.core_type<tc>, window_params = [{transform_indices = @transform_0, window_bounds = array<i64: 16, 32>}, {transform_indices = @transform_1, window_bounds = array<i64: 32, 32>}, {transform_indices = @transform_2, window_bounds = array<i64: 1, 32>}, {transform_indices = @transform_3, window_bounds = array<i64: 16, 32>}]} {
    %c0 = arith.constant 0 : index
    %c0_0 = arith.constant 0 : index
    %0 = vector.load %arg2[%c0, %c0_0] : memref<16x32xf32, #tpu.memory_space<vmem>>, vector<16x32xf32>
    %c0_1 = arith.constant 0 : index
    %c0_2 = arith.constant 0 : index
    %1 = vector.load %arg3[%c0_1, %c0_2] : memref<32x32xf32, #tpu.memory_space<vmem>>, vector<32x32xf32>
    %cst = arith.constant dense<0.000000e+00> : vector<16x32xf32>
    %2 = tpu.matmul %0, %1, %cst {dimension_numbers = #tpu.dot_dimension_numbers<[1], [0], [0], [1], [0, 0, 1, 1], [], []>} : vector<16x32xf32>, vector<32x32xf32>, vector<16x32xf32> -> vector<16x32xf32>
    %c0_3 = arith.constant 0 : index
    %c0_4 = arith.constant 0 : index
    %3 = vector.load %arg4[%c0_3, %c0_4] : memref<1x32xf32, #tpu.memory_space<vmem>>, vector<1x32xf32>
    %4 = vector.broadcast %3 : vector<1x32xf32> to vector<16x32xf32>
    %5 = arith.addf %2, %4 : vector<16x32xf32>
    %c0_5 = arith.constant 0 : index
    %c0_6 = arith.constant 0 : index
    %6 = vector.load %arg5[%c0_5, %c0_6] : memref<16x32xf32, #tpu.memory_space<vmem>>, vector<16x32xf32>
    tpu.vector_store %arg5[%c0_5, %c0_6], %5 {strides = array<i32>} : memref<16x32xf32, #tpu.memory_space<vmem>>, vector<16x32xf32>,
    return
  }
  func.func @transform_0(%arg0: i32, %arg1: i32) -> (i32, i32) {
    %c0_i32 = arith.constant 0 : i32
    %c0_i32_0 = arith.constant 0 : i32
    return %arg0, %c0_i32 : i32, i32
  }
  func.func @transform_1(%arg0: i32, %arg1: i32) -> (i32, i32) {
    %c0_i32 = arith.constant 0 : i32
    %c0_i32_0 = arith.constant 0 : i32
    return %c0_i32, %arg1 : i32, i32
  }
  func.func @transform_2(%arg0: i32, %arg1: i32) -> (i32, i32) {
    %c0_i32 = arith.constant 0 : i32
    %c0_i32_0 = arith.constant 0 : i32
    return %c0_i32, %arg1 : i32, i32
  }
  func.func @transform_3(%arg0: i32, %arg1: i32) -> (i32, i32) {
    %c0_i32 = arith.constant 0 : i32
    return %arg0, %arg1 : i32, i32
  }
}

</mosaic_0001>

<bundles_post_ra>
// kernel: tpu_custom_call.1
= control target key start
LH: loop header
LB: loop body
LE: loop exit
PB: predicated region body
PF: predicated region fallthrough
CT: control target
= control target key end

     0   :  { %8 = vsyncpa [#allocation3], 0  ;;  %s249_s0 = inlined_call_operand.hbm [shape: f32[16,32], index: 0, kind: input, shape index: {}]   ;;  %s250_s1 = inlined_call_operand.hbm [shape: f32[32,32], index: 1, kind: input, shape index: {}]   ;;  %s251_s2 = inlined_call_operand.vmem [shape: f32[1,32], index: 2, kind: input, shape index: {}]   ;;  %s252_s3 = inlined_call_operand.hbm [shape: f32[16,32], index: 3, kind: output, shape index: {}]  }
   0x1   :  { %9 = vsyncpa [#allocation6], 0 }
   0x2   :  { %10 = vsyncpa [#allocation4], 0  ;;  %s15_s14 = sshll.u32 %s249_s0, 4  ;;  %s199_s15 = smov [#allocation2]   ;;  %s16_s14 = int_to_ptr.hbm [resolvable:$true] %s15_s14 }
   0x3   :  { %s17_s16 = sshll.u32 %s199_s15, 4  ;;  %s28_s19 = sshll.u32 %s250_s1, 4  ;;  %s18_s16 = int_to_ptr.vmem [resolvable:$true] %s17_s16  ;;  %s29_s19 = int_to_ptr.hbm [resolvable:$true] %s28_s19 }
   0x4   :  { %s200_s20 = smov 128   ;;  %s201_s21 = smov 8  }
   0x5   :  { %23 = dma.hbm_to_vmem [thread:$0]  %s16_s14, 256, %s18_s16, [#allocation3], %s200_s20, %s200_s20, %s201_s21  }
   0x6   :  { %s202_s22 = smov [#allocation5]  }
   0x7   :  { %s30_s23 = sshll.u32 %s202_s22, 4  ;;  %s31_s23 = int_to_ptr.vmem [resolvable:$true] %s30_s23 }
   0x8   :  { %36 = dma.hbm_to_vmem [thread:$0]  %s29_s19, 512, %s31_s23, [#allocation6], %s200_s20, %s200_s20, %s201_s21  }
   0x9   :  { %193 = dma.done.wait [#allocation3], 256  }
   0xa   :  { %194 = vsyncadd [#allocation3], 4294967040 }
   0xb   :  { %195 = dma.done.wait [#allocation6], 512  }
   0xc   :  { %196 = vsyncadd [#allocation6], 4294966784  ;;  %v52_v0 = vld [vmem:[#allocation5 + $0x18] sm:$0xff]  ;;  %v51_v1 = vld [vmem:[#allocation5 + $0x10] sm:$0xff]  ;;  %vm57_vm0 = vcmask 261120   ;;  %s203_s24 = smov [#allocation7]  }
   0xd   :  { %76 = vmatpush.msra.mxu0 %v52_v0  ;;  %111 = vmatpush.msra.mxu1 %v52_v0  ;;  %v50_v2 = vld [vmem:[#allocation5 + $0x8] sm:$0xff]  ;;  %v49_v3 = vld [vmem:[#allocation5] sm:$0xff]  ;;  %v47_v4 = vld [vmem:[#allocation2] sm:$0xff]  ;;  %s93_s25 = sshll.u32 %s203_s24, 4  ;;  %s95_s28 = sshll.u32 %s252_s3, 4  ;;  %s94_s25 = int_to_ptr.vmem [resolvable:$true] %s93_s25  ;;  %s96_s28 = int_to_ptr.hbm [resolvable:$true] %s95_s28 }
   0xe   :  { %v48_v5 = vld [vmem:[#allocation2 + $0x8] sm:$0xff]  ;;  %v120_v6 = vld [vmem:[%s251_s2] ss:$0 sm:$0xff] }
   0xf   :  { %77 = vmatpush.msra.mxu0 %v51_v1  ;;  %112 = vmatpush.msra.mxu1 %v51_v1 }
  0x11   :  { %78 = vmatpush.msra.mxu0 %v50_v2  ;;  %113 = vmatpush.msra.mxu1 %v50_v2 }
  0x13   :  { %79 = vmatpush.msra.mxu0 %v49_v3  ;;  %114 = vmatpush.msra.mxu1 %v49_v3 }
  0x14   :  { %109 = vmatmul.msk.f32.vlgmr.msra.gmra.mxu0 %vm57_vm0, %v47_v4  ;;  %110 = vmatmul.msk.f32.vlgmr.msra.gmra.mxu1 %vm57_vm0, %v48_v5 }
  0x91   :  { %v81_v7 = vpop.f32.mrf.mxu0  ;;  %v84_v8 = vpop.f32.mrf.mxu1 }
  0x92   :  { %v82_v9 = vadd.f32 %v120_v6, %v81_v7  ;;  %v85_v10 = vadd.f32 %v120_v6, %v84_v8 }
  0x94   :  { %87 = vst.msk [vmem:[#allocation7] sm:$0xff] %vm57_vm0, %v82_v9 }
  0x95   :  { %88 = vst.msk [vmem:[#allocation7 + $0x8] sm:$0xff] %vm57_vm0, %v85_v10 }
  0x96   :  { %101 = dma.vmem_to_hbm [thread:$0]  %s94_s25, 256, %s96_s28, [#allocation4], %s200_s20, %s200_s20, %s201_s21  }
  0x97   :  { %197 = dma.done.wait [#allocation4], 256  }
  0x98   :  { %198 = vsyncadd [#allocation4], 4294967040 }
  0x99   :  { %106 = vsyncpa [#allocation3], 1 }
  0x9a   :  { %107 = vsyncpa [#allocation6], 1 }
  0x9b   :  { %108 = vsyncpa [#allocation4], 1 }

</bundles_post_ra>
